<compile_context>
chip_gen: v7x
topology: tpu7x:2x2x1
jax: 0.10.0
libtpu: 0.0.40
codegen_flags: <defaults>
</compile_context>

<pallas_src>
import functools

import jax
import jax.numpy as jnp
from jax.experimental import pallas as pl
from jax.experimental.pallas import tpu as pltpu


def _fused_mlp_kernel(x_ref, *refs, num_layers: int):
    """Fused MLP body: refs = (w0, b0, w1, b1, ..., w_last, b_last, o_ref)."""
    o_ref = refs[-1]
    h = x_ref[...].astype(jnp.float32)
    for i in range(num_layers):
        w = refs[2 * i][...]
        b = refs[2 * i + 1][...]          # (1, dout) -> broadcasts over batch
        h = jnp.dot(h, w, preferred_element_type=jnp.float32) + b
        if i != num_layers - 1:           # hidden_activation = relu
            h = jnp.maximum(h, 0.0)
        # last layer: output_activation = identity
    o_ref[...] = h.astype(o_ref.dtype)


def _batch_block(batch: int) -> int:
    # Single block for small batches (block == full dim satisfies the (8,128)
    # rule even if batch is not a multiple of 8); tile at 256 rows otherwise.
    return batch if batch <= 256 else 256


def mlp_forward(params, x):
    """MLP forward: hidden layers use ReLU, last layer is identity.

    params: list of (w, b) with w: (din, dout) and b: (1, dout).
    x:      (batch, input_size).
    """
    batch, din0 = x.shape
    num_layers = len(params)
    dout_last = params[-1][0].shape[1]

    block_b = _batch_block(batch)
    grid = (pl.cdiv(batch, block_b),)

    # x is tiled along batch; every weight/bias is a full resident block
    # shared by all batch tiles.  (Total weights here are a few KB; if layers
    # ever grow to multi-MiB, tile N/K instead of keeping them resident —
    # v7x only has 64 MiB of VMEM.)
    in_specs = [pl.BlockSpec((block_b, din0), lambda i: (i, 0))]
    flat_inputs = [x]
    for w, b in params:
        din, dout = w.shape
        in_specs.append(pl.BlockSpec((din, dout), lambda i: (0, 0)))
        in_specs.append(pl.BlockSpec((1, dout), lambda i: (0, 0)))
        flat_inputs.append(w)
        flat_inputs.append(b)

    kernel = functools.partial(_fused_mlp_kernel, num_layers=num_layers)

    return pl.pallas_call(
        kernel,
        out_shape=jax.ShapeDtypeStruct((batch, dout_last), x.dtype),
        grid=grid,
        in_specs=in_specs,
        out_specs=pl.BlockSpec((block_b, dout_last), lambda i: (i, 0)),
        compiler_params=pltpu.CompilerParams(
            dimension_semantics=("parallel",)),
    )(*flat_inputs)


def init_mlp_params(key, input_size, hidden_sizes, output_size):
    """Deterministic init matching torch.nn.Linear (uniform +/- 1/sqrt(fan_in)).

    Biases are stored pre-shaped as (1, out_features).
    """
    sizes = [input_size] + list(hidden_sizes) + [output_size]
    params = []
    for i in range(len(sizes) - 1):
        fan_in, fan_out = sizes[i], sizes[i + 1]
        key, kw, kb = jax.random.split(key, 3)
        bound = 1.0 / jnp.sqrt(fan_in)
        w = jax.random.uniform(kw, (fan_in, fan_out), jnp.float32, -bound, bound)
        b = jax.random.uniform(kb, (1, fan_out), jnp.float32, -bound, bound)
        params.append((w, b))
    return params


if __name__ == "__main__":
    # Shapes consistent with the module:
    # MLP(hidden_sizes=[32, 32], output_size=8, input_size=16), batch=8.
    input_size = 16
    hidden_sizes = (32, 32)
    output_size = 8
    batch = 8

    key = jax.random.PRNGKey(0)
    key, kx = jax.random.split(key)
    x = jax.random.normal(kx, (batch, input_size), jnp.float32)

    params = init_mlp_params(key, input_size, hidden_sizes, output_size)

    out = jax.jit(mlp_forward)(params, x)
    jax.block_until_ready(out)

    # Pure-JAX reference check.
    h_ref = x
    for i, (w, b) in enumerate(params):
        h_ref = h_ref @ w + b
        if i != len(params) - 1:
            h_ref = jnp.maximum(h_ref, 0.0)
    assert out.shape == (batch, output_size)
    assert jnp.allclose(out, h_ref, atol=1e-5, rtol=1e-5)

    print("KERNEL_OK")
</pallas_src>

<mosaic_0001>
module attributes {stable_mosaic.version = 11 : i64} {
  func.func @_fused_mlp_kernel(%arg0: i32, %arg1: memref<8x16xf32, #tpu.memory_space<vmem>>, %arg2: memref<16x32xf32, #tpu.memory_space<vmem>>, %arg3: memref<1x32xf32, #tpu.memory_space<vmem>>, %arg4: memref<32x32xf32, #tpu.memory_space<vmem>>, %arg5: memref<1x32xf32, #tpu.memory_space<vmem>>, %arg6: memref<32x8xf32, #tpu.memory_space<vmem>>, %arg7: memref<1x8xf32, #tpu.memory_space<vmem>>, %arg8: memref<8x8xf32, #tpu.memory_space<vmem>>) attributes {dimension_semantics = [#tpu.dimension_semantics<parallel>], iteration_bounds = array<i64: 1>, scalar_prefetch = 0 : i64, scratch_operands = 0 : i64, tpu.core_type = #tpu.core_type<tc>, window_params = [{transform_indices = @transform_0, window_bounds = array<i64: 8, 16>}, {pipeline_mode = #tpu.pipeline_mode<synchronous>, transform_indices = @transform_1, window_bounds = array<i64: 16, 32>}, {pipeline_mode = #tpu.pipeline_mode<synchronous>, transform_indices = @transform_2, window_bounds = array<i64: 1, 32>}, {pipeline_mode = #tpu.pipeline_mode<synchronous>, transform_indices = @transform_3, window_bounds = array<i64: 32, 32>}, {pipeline_mode = #tpu.pipeline_mode<synchronous>, transform_indices = @transform_4, window_bounds = array<i64: 1, 32>}, {pipeline_mode = #tpu.pipeline_mode<synchronous>, transform_indices = @transform_5, window_bounds = array<i64: 32, 8>}, {pipeline_mode = #tpu.pipeline_mode<synchronous>, transform_indices = @transform_6, window_bounds = array<i64: 1, 8>}, {transform_indices = @transform_7, window_bounds = array<i64: 8, 8>}]} {
    %c0 = arith.constant 0 : index
    %c0_0 = arith.constant 0 : index
    %0 = vector.load %arg1[%c0, %c0_0] : memref<8x16xf32, #tpu.memory_space<vmem>>, vector<8x16xf32>
    %c0_1 = arith.constant 0 : index
    %c0_2 = arith.constant 0 : index
    %1 = vector.load %arg2[%c0_1, %c0_2] : memref<16x32xf32, #tpu.memory_space<vmem>>, vector<16x32xf32>
    %c0_3 = arith.constant 0 : index
    %c0_4 = arith.constant 0 : index
    %2 = vector.load %arg3[%c0_3, %c0_4] : memref<1x32xf32, #tpu.memory_space<vmem>>, vector<1x32xf32>
    %cst = arith.constant dense<0.000000e+00> : vector<8x32xf32>
    %3 = tpu.matmul %0, %1, %cst {dimension_numbers = #tpu.dot_dimension_numbers<[1], [0], [0], [1], [0, 0, 1, 1], [], []>} : vector<8x16xf32>, vector<16x32xf32>, vector<8x32xf32> -> vector<8x32xf32>
    %4 = vector.broadcast %2 : vector<1x32xf32> to vector<8x32xf32>
    %5 = arith.addf %3, %4 : vector<8x32xf32>
    %cst_5 = arith.constant 0.000000e+00 : f32
    %6 = vector.broadcast %cst_5 : f32 to vector<8x32xf32>
    %7 = arith.maximumf %5, %6 : vector<8x32xf32>
    %c0_6 = arith.constant 0 : index
    %c0_7 = arith.constant 0 : index
    %8 = vector.load %arg4[%c0_6, %c0_7] : memref<32x32xf32, #tpu.memory_space<vmem>>, vector<32x32xf32>
    %c0_8 = arith.constant 0 : index
    %c0_9 = arith.constant 0 : index
    %9 = vector.load %arg5[%c0_8, %c0_9] : memref<1x32xf32, #tpu.memory_space<vmem>>, vector<1x32xf32>
    %cst_10 = arith.constant dense<0.000000e+00> : vector<8x32xf32>
    %10 = tpu.matmul %7, %8, %cst_10 {dimension_numbers = #tpu.dot_dimension_numbers<[1], [0], [0], [1], [0, 0, 1, 1], [], []>} : vector<8x32xf32>, vector<32x32xf32>, vector<8x32xf32> -> vector<8x32xf32>
    %11 = vector.broadcast %9 : vector<1x32xf32> to vector<8x32xf32>
    %12 = arith.addf %10, %11 : vector<8x32xf32>
    %cst_11 = arith.constant 0.000000e+00 : f32
    %13 = vector.broadcast %cst_11 : f32 to vector<8x32xf32>
    %14 = arith.maximumf %12, %13 : vector<8x32xf32>
    %c0_12 = arith.constant 0 : index
    %c0_13 = arith.constant 0 : index
    %15 = vector.load %arg6[%c0_12, %c0_13] : memref<32x8xf32, #tpu.memory_space<vmem>>, vector<32x8xf32>
    %c0_14 = arith.constant 0 : index
    %c0_15 = arith.constant 0 : index
    %16 = vector.load %arg7[%c0_14, %c0_15] : memref<1x8xf32, #tpu.memory_space<vmem>>, vector<1x8xf32>
    %cst_16 = arith.constant dense<0.000000e+00> : vector<8x8xf32>
    %17 = tpu.matmul %14, %15, %cst_16 {dimension_numbers = #tpu.dot_dimension_numbers<[1], [0], [0], [1], [0, 0, 1, 1], [], []>} : vector<8x32xf32>, vector<32x8xf32>, vector<8x8xf32> -> vector<8x8xf32>
    %18 = vector.broadcast %16 : vector<1x8xf32> to vector<8x8xf32>
    %19 = arith.addf %17, %18 : vector<8x8xf32>
    %c0_17 = arith.constant 0 : index
    %c0_18 = arith.constant 0 : index
    %20 = vector.load %arg8[%c0_17, %c0_18] : memref<8x8xf32, #tpu.memory_space<vmem>>, vector<8x8xf32>
    tpu.vector_store %arg8[%c0_17, %c0_18], %19 {strides = array<i32>} : memref<8x8xf32, #tpu.memory_space<vmem>>, vector<8x8xf32>,
    return
  }
  func.func @transform_0(%arg0: i32) -> (i32, i32) {
    %c0_i32 = arith.constant 0 : i32
    %c0_i32_0 = arith.constant 0 : i32
    return %arg0, %c0_i32 : i32, i32
  }
  func.func @transform_1(%arg0: i32) -> (i32, i32) {
    %c0_i32 = arith.constant 0 : i32
    %c0_i32_0 = arith.constant 0 : i32
    %c0_i32_1 = arith.constant 0 : i32
    return %c0_i32, %c0_i32_0 : i32, i32
  }
  func.func @transform_2(%arg0: i32) -> (i32, i32) {
    %c0_i32 = arith.constant 0 : i32
    %c0_i32_0 = arith.constant 0 : i32
    %c0_i32_1 = arith.constant 0 : i32
    return %c0_i32, %c0_i32_0 : i32, i32
  }
  func.func @transform_3(%arg0: i32) -> (i32, i32) {
    %c0_i32 = arith.constant 0 : i32
    %c0_i32_0 = arith.constant 0 : i32
    %c0_i32_1 = arith.constant 0 : i32
    return %c0_i32, %c0_i32_0 : i32, i32
  }
  func.func @transform_4(%arg0: i32) -> (i32, i32) {
    %c0_i32 = arith.constant 0 : i32
    %c0_i32_0 = arith.constant 0 : i32
    %c0_i32_1 = arith.constant 0 : i32
    return %c0_i32, %c0_i32_0 : i32, i32
  }
  func.func @transform_5(%arg0: i32) -> (i32, i32) {
    %c0_i32 = arith.constant 0 : i32
    %c0_i32_0 = arith.constant 0 : i32
    %c0_i32_1 = arith.constant 0 : i32
    return %c0_i32, %c0_i32_0 : i32, i32
  }
  func.func @transform_6(%arg0: i32) -> (i32, i32) {
    %c0_i32 = arith.constant 0 : i32
    %c0_i32_0 = arith.constant 0 : i32
    %c0_i32_1 = arith.constant 0 : i32
    return %c0_i32, %c0_i32_0 : i32, i32
  }
  func.func @transform_7(%arg0: i32) -> (i32, i32) {
    %c0_i32 = arith.constant 0 : i32
    %c0_i32_0 = arith.constant 0 : i32
    return %arg0, %c0_i32 : i32, i32
  }
}

</mosaic_0001>

<bundles_post_ra>
// kernel: mlp_forward.1
= control target key start
LH: loop header
LB: loop body
LE: loop exit
PB: predicated region body
PF: predicated region fallthrough
CT: control target
= control target key end

     0   :  { %12 = vsyncpa [#allocation3], 0  ;;  %s541_s0 = inlined_call_operand.vmem [shape: f32[8,16], index: 0, kind: input, shape index: {}]   ;;  %s542_s1 = inlined_call_operand.hbm [shape: f32[16,32], index: 1, kind: input, shape index: {}]   ;;  %s543_s2 = inlined_call_operand.vmem [shape: f32[1,32], index: 2, kind: input, shape index: {}]   ;;  %s544_s3 = inlined_call_operand.vmem [shape: f32[32,32], index: 3, kind: input, shape index: {}]   ;;  %s545_s4 = inlined_call_operand.vmem [shape: f32[1,32], index: 4, kind: input, shape index: {}]   ;;  %s546_s5 = inlined_call_operand.vmem [shape: f32[32,8], index: 5, kind: input, shape index: {}]   ;;  %s547_s6 = inlined_call_operand.vmem [shape: f32[1,8], index: 6, kind: input, shape index: {}]   ;;  %s548_s7 = inlined_call_operand.hbm [shape: f32[8,8], index: 7, kind: output, shape index: {}]  }
   0x1   :  { %13 = vsyncpa [#allocation4], 0  ;;  %s431_s24 = smov [#allocation2]   ;;  %s383_s28 = scalar_lea.hbm %s542_s1, 256 }
   0x2   :  { %s21_s25 = sshll.u32 %s431_s24, 4  ;;  %p384_p0 = scmp.ne.s32.totalorder %s542_s1, %s383_s28  ;;  %s22_s25 = int_to_ptr.vmem [resolvable:$true] %s21_s25 }
   0x3   :  { %p387_p1 = scmp.lt.u32.totalorder %s383_s28, %s542_s1 }
   0x5   :  { %p389_p2 = pnand %p387_p1, %p384_p0 }
   0x7   :  { %392 = shalt.err (!%p389_p2)
}
   0x8   :  { %s393_s10 = scalar_lea.vmem %s22_s25, 256  ;;  %p398_p4 = scmp.lt.s32.totalorder %s22_s25, %s22_s25 }
   0x9   :  { %p394_p3 = scmp.ne.s32.totalorder %s22_s25, %s393_s10  ;;  %p399_p5 = scmp.lt.s32.totalorder %s393_s10, %s393_s10 }
   0xb   :  { %p400_p6 = por %p399_p5, %p398_p4 }
   0xd   :  { %p401_p7 = pnand %p400_p6, %p394_p3 }
   0xf   :  { %404 = shalt.err (!%p401_p7)
}
  0x10   :  { %s432_s11 = smov 128   ;;  %s433_s12 = smov 8  }
  0x11   :  { %27 = dma.hbm_to_vmem [thread:$0]  %s542_s1, 256, %s22_s25, [#allocation3], %s432_s11, %s432_s11, %s433_s12  }
  0x12   :  { %427 = dma.done.wait [#allocation3], 256  }
  0x13   :  { %428 = vsyncadd [#allocation3], 4294967040  ;;  %v434_v0 = vmov 0.0|0.0   ;;  %vm435_vm0 = vmmov 0   ;;  %v436_v1 = vmov 0.0   ;;  %v42_v2 = vld [vmem:[#allocation2] sm:$0xff] }
  0x14   :  { %361 = vmatprep.subr.bf16.mxu0 %v434_v0  ;;  %336 = vmatprep.mubr.msk.f32.mxu0 %vm435_vm0, %v436_v1  ;;  %v43_v3 = vld [vmem:[#allocation2 + $0x8] sm:$0xff]  ;;  %v126_v5 = vld [vmem:[%s544_s3] sm:$0xff]  ;;  %vm51_vm1 = vcmask 130048   ;;  %v128_v9 = vld [vmem:[%s544_s3 + $0x10] sm:$0xff]  ;;  %vm137_vm2 = vcmask 261120   ;;  %s437_s12 = smov [#allocation5]  }
  0x15   :  { %364 = vmatprep.subr.bf16.mxu1 %v434_v0  ;;  %347 = vmatprep.mubr.msk.f32.mxu1 %vm435_vm0, %v436_v1  ;;  %v362_v4 = vpack.c.bf16 %v43_v3, %v42_v2  ;;  %v127_v6 = vld [vmem:[%s544_s3 + $0x8] sm:$0xff]  ;;  %v41_v8 = vld [vmem:[%s541_s0] sm:$0xff]  ;;  %v129_v10 = vld [vmem:[%s544_s3 + $0x18] sm:$0xff]  ;;  %s304_s13 = sshll.u32 %s437_s12, 4  ;;  %vm296_vm3 = vcmask 64512   ;;  %s305_s13 = int_to_ptr.vmem [resolvable:$true] %s304_s13 }
  0x16   :  { %v365_v7 = vpack.c.bf16 %v127_v6, %v126_v5  ;;  %v368_v11 = vpack.c.bf16 %v129_v10, %v128_v9  ;;  %v212_v12 = vld [vmem:[%s546_s5] sm:$0xff]  ;;  %v213_v13 = vld [vmem:[%s546_s5 + $0x8] sm:$0xff]  ;;  %v214_v20 = vld [vmem:[%s546_s5 + $0x10] sm:$0xff]  ;;  %p410_p9 = scmp.lt.s32.totalorder %s305_s13, %s305_s13 }
  0x17   :  { %363 = vmatpush3.bf16.msra.mxu0 %v362_v4  ;;  %v371_v14 = vpack.c.bf16 %v213_v13, %v212_v12  ;;  %v313_v15 = vld [vmem:[%s543_s2] ss:$0 sm:$0xff]  ;;  %v215_v21 = vld [vmem:[%s546_s5 + $0x18] sm:$0xff]  ;;  %s405_s5 = scalar_lea.vmem %s305_s13, 128 }
  0x18   :  { %366 = vmatpush3.bf16.msra.mxu1 %v365_v7  ;;  %370 = vmatprep.subr.bf16.mxu0 %v434_v0  ;;  %v374_v22 = vpack.c.bf16 %v215_v21, %v214_v20  ;;  %v315_v23 = vld [vmem:[%s545_s4] ss:$0 sm:$0xff]  ;;  %p406_p8 = scmp.ne.s32.totalorder %s305_s13, %s405_s5  ;;  %p411_p10 = scmp.lt.s32.totalorder %s405_s5, %s405_s5 }
  0x19   :  { %367 = vmatprep.subr.bf16.mxu1 %v434_v0  ;;  %v317_v28 = vld [vmem:[%s547_s6] ss:$0 sm:$0xff] }
  0x1a   :  { %337 = vmatmul.mubr.msk.f32.vlgmr.msra.gmra.mrb[0].mxu0 %vm51_vm1, %v41_v8  ;;  %p412_p11 = por %p411_p10, %p410_p9 }
  0x1b   :  { %358 = vmatprep.mubr.msk.f32.mxu0 %vm435_vm0, %v436_v1  ;;  %372 = vmatpush3.bf16.msra.mxu0 %v371_v14 }
  0x1c   :  { %369 = vmatpush3.bf16.msra.mxu1 %v368_v11  ;;  %373 = vmatprep.subr.bf16.mxu0 %v434_v0  ;;  %p413_p12 = pnand %p412_p11, %p406_p8 }
  0x1f   :  { %375 = vmatpush3.bf16.msra.mxu0 %v374_v22 }
  0xed   :  { %v121_v16 = vpop.f32.mrb[0].mxu0 }
  0xee   :  { %v122_v17 = vadd.f32 %v313_v15, %v121_v16  ;;  %v338_v18 = vpop.f32.mrb[1].mxu0 }
  0xf0   :  { %v125_v19 = vmax.f32 %v122_v17, 0.0 }
  0xf2   :  { %348 = vmatmul.mubr.msk.f32.vlgmr.msra.gmra.mrb[0].mxu1 %vm137_vm2, %v125_v19 }
 0x1c5   :  { %v207_v24 = vpop.f32.mrb[0].mxu1 }
 0x1c6   :  { %v208_v25 = vadd.f32 %v315_v23, %v207_v24  ;;  %v349_v26 = vpop.f32.mrb[1].mxu1 }
 0x1c8   :  { %v211_v27 = vmax.f32 %v208_v25, 0.0 }
 0x1ca   :  { %359 = vmatmul.mubr.msk.f32.vlgmr.msra.gmra.mrb[2].mxu0 %vm137_vm2, %v211_v27 }
 0x29d   :  { %v292_v29 = vpop.f32.mrb[2].mxu0 }
 0x29e   :  { %v293_v30 = vadd.f32 %v317_v28, %v292_v29  ;;  %v360_v31 = vpop.f32.mrb[3].mxu0 }
 0x2a0   :  { %297 = vst.msk [vmem:[#allocation5] sm:$0xff] %vm296_vm3, %v293_v30 }
 0x2a1   :  { %416 = shalt.err (!%p413_p12)
}
 0x2a2   :  { %s417_s15 = scalar_lea.hbm %s548_s7, 128 }
 0x2a3   :  { %p418_p13 = scmp.ne.s32.totalorder %s548_s7, %s417_s15  ;;  %p421_p0 = scmp.lt.u32.totalorder %s417_s15, %s548_s7 }
 0x2a5   :  { %p423_p1 = pnand %p421_p0, %p418_p13 }
 0x2a7   :  { %426 = shalt.err (!%p423_p1)
}
 0x2a8   :  { %307 = dma.vmem_to_hbm [thread:$0]  %s305_s13, 128, %s548_s7, [#allocation4]  }
 0x2a9   :  { %429 = dma.done.wait [#allocation4], 128  }
 0x2aa   :  { %430 = vsyncadd [#allocation4], 4294967168 }
 0x2ab   :  { %311 = vsyncpa [#allocation3], 1 }
 0x2ac   :  { %312 = vsyncpa [#allocation4], 1 }

</bundles_post_ra>
